<compile_context>
chip_gen: v7x
topology: tpu7x:2x2x1
jax: 0.10.0
libtpu: 0.0.40
codegen_flags: <defaults>
</compile_context>

<pallas_src>
import functools

import jax
import jax.numpy as jnp
from jax import lax
from jax.experimental import pallas as pl
from jax.experimental.pallas import tpu as pltpu

LANE = 128
MAX_TILE_ROWS = 1024  # 1024 x 128 x 4B = 512 KiB per block

# hash constants (distinct odd multipliers + murmur3 fmix32 finalizer)
_M_IDX = 0x9E3779B9
_M_SEED = 0x7FEB352D
_F1 = 0x85EBCA6B
_F2 = 0xC2B2AE35


def _dropout_kernel(seed_ref, x_ref, o_ref, *, threshold, scale, tile_rows):
    """Inverted dropout on one (tile_rows, LANE) tile using counter-hash RNG."""
    pid = pl.program_id(0)
    shape = x_ref.shape
    row = lax.broadcasted_iota(jnp.int32, shape, 0)
    col = lax.broadcasted_iota(jnp.int32, shape, 1)
    # globally unique per-element counter
    idx = ((pid * tile_rows + row) * LANE + col).astype(jnp.uint32)
    seed = seed_ref[0].astype(jnp.uint32)
    # mix counter and seed with distinct multipliers, then fmix32 avalanche
    h = idx * jnp.uint32(_M_IDX) ^ (seed * jnp.uint32(_M_SEED))
    h = h ^ (h >> jnp.uint32(16))
    h = h * jnp.uint32(_F1)
    h = h ^ (h >> jnp.uint32(13))
    h = h * jnp.uint32(_F2)
    h = h ^ (h >> jnp.uint32(16))
    keep = h >= jnp.uint32(threshold)  # P(keep) = 1 - p, single u32 compare
    x = x_ref[...]
    o_ref[...] = jnp.where(keep, x * jnp.asarray(scale, x.dtype),
                           jnp.zeros_like(x))


def dropout_values(values, p, seed, training=True):
    """Pallas dropout over a flat value vector (semantics of F.dropout)."""
    p = float(p)
    if (not training) or p <= 0.0 or values.size == 0:
        return values
    if p >= 1.0:
        return jnp.zeros_like(values)

    nnz = values.shape[0]
    itemsize = jnp.dtype(values.dtype).itemsize
    rows = pl.cdiv(nnz, LANE)
    tile_rows = min(MAX_TILE_ROWS, ((rows + 7) // 8) * 8)  # multiple of 8
    rows_padded = pl.cdiv(rows, tile_rows) * tile_rows
    padded = rows_padded * LANE

    # TODO(synk): callers that keep the value buffer lane/block padded
    # end-to-end skip this pad + final slice (the reshape itself is free).
    x = values if padded == nnz else jnp.pad(values, (0, padded - nnz))
    x2 = x.reshape(rows_padded, LANE)

    threshold = min(max(int(round(p * (1 << 32))), 0), (1 << 32) - 1)
    scale = 1.0 / (1.0 - p)

    out = pl.pallas_call(
        functools.partial(_dropout_kernel, threshold=threshold, scale=scale,
                          tile_rows=tile_rows),
        out_shape=jax.ShapeDtypeStruct((rows_padded, LANE), values.dtype),
        grid_spec=pltpu.PrefetchScalarGridSpec(
            num_scalar_prefetch=1,
            grid=(rows_padded // tile_rows,),
            in_specs=[pl.BlockSpec((tile_rows, LANE), lambda i, s_ref: (i, 0))],
            out_specs=pl.BlockSpec((tile_rows, LANE), lambda i, s_ref: (i, 0)),
        ),
        compiler_params=pltpu.CompilerParams(
            dimension_semantics=("parallel",),  # counter-based RNG: order-free
        ),
        cost_estimate=pl.CostEstimate(
            flops=padded, transcendentals=0,
            bytes_accessed=2 * padded * itemsize),
    )(jnp.asarray([seed], jnp.int32), x2)

    out_flat = out.reshape(-1)
    return out_flat if padded == nnz else out_flat[:nnz]


def sparse_dropout(rowptr, col, values, *, p, seed, training=True):
    """JAX analog of SparseDropout.forward on a CSR (rowptr, col, values).

    Structure (rowptr/col) is passed through untouched; dropout is applied
    to the values only, matching the PyTorch module.
    """
    return rowptr, col, dropout_values(values, p, seed, training=training)


def _make_sparse_csr(key, n_rows, n_cols, nnz_per_row):
    """Deterministic small CSR matrix for testing."""
    k_col, k_val = jax.random.split(key)
    nnz = n_rows * nnz_per_row
    col = jax.random.randint(k_col, (n_rows, nnz_per_row), 0, n_cols, jnp.int32)
    col = jnp.sort(col, axis=-1).reshape(-1)
    rowptr = jnp.arange(n_rows + 1, dtype=jnp.int32) * nnz_per_row
    values = jax.random.normal(k_val, (nnz,), jnp.float32)
    return rowptr, col, values


if __name__ == "__main__":
    key = jax.random.PRNGKey(0)
    p = 0.5
    scale = 1.0 / (1.0 - p)

    # ---- small CSR case (nnz = 128) ----
    n_rows, n_cols, nnz_per_row = 16, 16, 8
    rowptr, col, values = _make_sparse_csr(key, n_rows, n_cols, nnz_per_row)

    out_rowptr, out_col, out_values = sparse_dropout(
        rowptr, col, values, p=p, seed=0, training=True)
    out_values = jax.block_until_ready(out_values)

    assert out_values.shape == values.shape
    assert out_rowptr.shape == rowptr.shape and out_col.shape == col.shape
    kept = out_values != 0.0
    assert bool(jnp.all(jnp.isfinite(out_values)))
    assert bool(jnp.all(jnp.where(
        kept, jnp.abs(out_values - values * scale) < 1e-5, out_values == 0.0)))

    # eval mode (training=False) is identity
    eval_values = jax.block_until_ready(
        sparse_dropout(rowptr, col, values, p=p, seed=0, training=False)[2])
    assert bool(jnp.all(eval_values == values))

    # ---- multi-block, non-aligned case (exercises padding + grid > 1) ----
    big_nnz = 2 * MAX_TILE_ROWS * LANE + 37
    big_vals = jax.random.normal(jax.random.PRNGKey(1), (big_nnz,), jnp.float32)
    big_out = jax.block_until_ready(dropout_values(big_vals, p, seed=3))
    assert big_out.shape == big_vals.shape
    big_kept = big_out != 0.0
    assert bool(jnp.all(jnp.where(
        big_kept, jnp.abs(big_out - big_vals * scale) < 1e-4, big_out == 0.0)))
    keep_frac = float(jnp.mean(big_kept.astype(jnp.float32)))
    assert 0.45 < keep_frac < 0.55, keep_frac

    print("KERNEL_OK")
</pallas_src>

<mosaic_0001>
module attributes {stable_mosaic.version = 11 : i64} {
  func.func @_dropout_kernel(%arg0: i32, %arg1: memref<1xi32, #tpu.memory_space<smem>>, %arg2: memref<8x128xf32, #tpu.memory_space<vmem>>, %arg3: memref<8x128xf32, #tpu.memory_space<vmem>>) attributes {dimension_semantics = [#tpu.dimension_semantics<parallel>], iteration_bounds = array<i64: 1>, scalar_prefetch = 1 : i64, scratch_operands = 0 : i64, tpu.core_type = #tpu.core_type<tc>, window_params = [{transform_indices = @transform_0, window_bounds = array<i64: 8, 128>}, {transform_indices = @transform_1, window_bounds = array<i64: 8, 128>}]} {
    %0 = tpu.iota {dimensions = array<i32: 0>} : vector<8x128xi32>
    %1 = tpu.iota {dimensions = array<i32: 1>} : vector<8x128xi32>
    %c8_i32 = arith.constant 8 : i32
    %2 = arith.muli %arg0, %c8_i32 : i32
    %3 = vector.broadcast %2 : i32 to vector<8x128xi32>
    %4 = arith.addi %3, %0 : vector<8x128xi32>
    %c128_i32 = arith.constant 128 : i32
    %5 = vector.broadcast %c128_i32 : i32 to vector<8x128xi32>
    %6 = arith.muli %4, %5 : vector<8x128xi32>
    %7 = arith.addi %6, %1 : vector<8x128xi32>
    %c0 = arith.constant 0 : index
    %8 = memref.load %arg1[%c0] : memref<1xi32, #tpu.memory_space<smem>>
    %c-1640531527_i32 = arith.constant -1640531527 : i32
    %9 = vector.broadcast %c-1640531527_i32 : i32 to vector<8x128xi32>
    %10 = arith.muli %7, %9 : vector<8x128xi32>
    %c2146121005_i32 = arith.constant 2146121005 : i32
    %11 = arith.muli %8, %c2146121005_i32 : i32
    %12 = vector.broadcast %11 : i32 to vector<8x128xi32>
    %13 = arith.xori %10, %12 : vector<8x128xi32>
    %c16_i32 = arith.constant 16 : i32
    %14 = vector.broadcast %c16_i32 : i32 to vector<8x128xi32>
    %15 = arith.shrui %13, %14 : vector<8x128xi32>
    %16 = arith.xori %13, %15 : vector<8x128xi32>
    %c-2048144789_i32 = arith.constant -2048144789 : i32
    %17 = vector.broadcast %c-2048144789_i32 : i32 to vector<8x128xi32>
    %18 = arith.muli %16, %17 : vector<8x128xi32>
    %c13_i32 = arith.constant 13 : i32
    %19 = vector.broadcast %c13_i32 : i32 to vector<8x128xi32>
    %20 = arith.shrui %18, %19 : vector<8x128xi32>
    %21 = arith.xori %18, %20 : vector<8x128xi32>
    %c-1028477387_i32 = arith.constant -1028477387 : i32
    %22 = vector.broadcast %c-1028477387_i32 : i32 to vector<8x128xi32>
    %23 = arith.muli %21, %22 : vector<8x128xi32>
    %c16_i32_0 = arith.constant 16 : i32
    %24 = vector.broadcast %c16_i32_0 : i32 to vector<8x128xi32>
    %25 = arith.shrui %23, %24 : vector<8x128xi32>
    %26 = arith.xori %23, %25 : vector<8x128xi32>
    %c-2147483648_i32 = arith.constant -2147483648 : i32
    %27 = vector.broadcast %c-2147483648_i32 : i32 to vector<8x128xi32>
    %28 = arith.cmpi uge, %26, %27 : vector<8x128xi32>
    %c0_1 = arith.constant 0 : index
    %c0_2 = arith.constant 0 : index
    %29 = vector.load %arg2[%c0_1, %c0_2] : memref<8x128xf32, #tpu.memory_space<vmem>>, vector<8x128xf32>
    %cst = arith.constant 2.000000e+00 : f32
    %30 = vector.broadcast %cst : f32 to vector<8x128xf32>
    %31 = arith.mulf %29, %30 : vector<8x128xf32>
    %cst_3 = arith.constant 0.000000e+00 : f32
    %32 = vector.broadcast %cst_3 : f32 to vector<8x128xf32>
    %33 = arith.select %28, %31, %32 : vector<8x128xi1>, vector<8x128xf32>
    %c0_4 = arith.constant 0 : index
    %c0_5 = arith.constant 0 : index
    %34 = vector.load %arg3[%c0_4, %c0_5] : memref<8x128xf32, #tpu.memory_space<vmem>>, vector<8x128xf32>
    tpu.vector_store %arg3[%c0_4, %c0_5], %33 {strides = array<i32>} : memref<8x128xf32, #tpu.memory_space<vmem>>, vector<8x128xf32>,
    return
  }
  func.func @transform_0(%arg0: i32, %arg1: memref<1xi32, #tpu.memory_space<smem>>) -> (i32, i32) {
    %c0_i32 = arith.constant 0 : i32
    %c0_i32_0 = arith.constant 0 : i32
    return %arg0, %c0_i32 : i32, i32
  }
  func.func @transform_1(%arg0: i32, %arg1: memref<1xi32, #tpu.memory_space<smem>>) -> (i32, i32) {
    %c0_i32 = arith.constant 0 : i32
    %c0_i32_0 = arith.constant 0 : i32
    return %arg0, %c0_i32 : i32, i32
  }
}

</mosaic_0001>

<bundles_post_ra>
// kernel: tpu_custom_call.1
= control target key start
LH: loop header
LB: loop body
LE: loop exit
PB: predicated region body
PF: predicated region fallthrough
CT: control target
= control target key end

     0   :  { %8 = vsyncpa [#allocation5], 0  ;;  %s159_s0 = inlined_call_operand.<no memory space> [shape: s32[1], index: 0, kind: input, shape index: {}]   ;;  %s160_s1 = inlined_call_operand.hbm [shape: f32[8,128], index: 1, kind: input, shape index: {}]   ;;  %s161_s2 = inlined_call_operand.hbm [shape: f32[8,128], index: 2, kind: output, shape index: {}]  }
   0x1   :  { %9 = vsyncpa [#allocation6], 0  ;;  %s115_s9 = smov [#allocation4]   ;;  %s67_s13 = scalar_lea.hbm %s160_s1, 128 }
   0x2   :  { %s16_s10 = sshll.u32 %s115_s9, 4  ;;  %p68_p0 = scmp.ne.s32.totalorder %s160_s1, %s67_s13  ;;  %s17_s10 = int_to_ptr.vmem [resolvable:$true] %s16_s10 }
   0x3   :  { %p71_p1 = scmp.lt.u32.totalorder %s67_s13, %s160_s1 }
   0x5   :  { %p73_p2 = pnand %p71_p1, %p68_p0 }
   0x7   :  { %76 = shalt.err (!%p73_p2)
}
   0x8   :  { %s77_s18 = scalar_lea.vmem %s17_s10, 128  ;;  %p82_p4 = scmp.lt.s32.totalorder %s17_s10, %s17_s10 }
   0x9   :  { %p78_p3 = scmp.ne.s32.totalorder %s17_s10, %s77_s18  ;;  %p83_p5 = scmp.lt.s32.totalorder %s77_s18, %s77_s18 }
   0xb   :  { %p84_p6 = por %p83_p5, %p82_p4 }
   0xd   :  { %p85_p7 = pnand %p84_p6, %p78_p3 }
   0xf   :  { %88 = shalt.err (!%p85_p7)
}
  0x10   :  { %19 = dma.hbm_to_vmem [thread:$0]  %s160_s1, 128, %s17_s10, [#allocation5]  }
  0x11   :  { %111 = dma.done.wait [#allocation5], 128  }
  0x12   :  { %112 = vsyncadd [#allocation5], 4294967168  ;;  %v23_v0 = vlaneseq  ;;  %s34_s23 = smul.u32 2146121005, %s159_s0  ;;  %v46_v14 = vld [vmem:[#allocation4] sm:$0xff]  ;;  %s116_s1 = smov [#allocation7]  }
  0x13   :  { %v47_v16 = vmul.f32 2.0, %v46_v14  ;;  %s56_s24 = sshll.u32 %s116_s1, 4  ;;  %s57_s24 = int_to_ptr.vmem [resolvable:$true] %s56_s24 }
  0x14   :  { %v24_v1 = vshrl.u32 %v23_v0, 7  ;;  %v26_v2 = vand.u32 127, %v23_v0  ;;  %v35_v5 = vstv %s34_s23  ;;  %s89_s0 = scalar_lea.vmem %s57_s24, 128  ;;  %p94_p9 = scmp.lt.s32.totalorder %s57_s24, %s57_s24 }
  0x15   :  { %p90_p8 = scmp.ne.s32.totalorder %s57_s24, %s89_s0  ;;  %p95_p10 = scmp.lt.s32.totalorder %s89_s0, %s89_s0 }
  0x16   :  { %v30_v3 = vmul.u32 128, %v24_v1 }
  0x17   :  { %p96_p11 = por %p95_p10, %p94_p9 }
  0x18   :  { %v31_v4 = vadd.s32 %v30_v3, %v26_v2 }
  0x19   :  { %p97_p12 = pnand %p96_p11, %p90_p8 }
  0x1a   :  { %v33_v6 = vmul.u32 2654435769, %v31_v4 }
  0x1c   :  { %v36_v7 = vxor.u32 %v35_v5, %v33_v6 }
  0x1e   :  { %v37_v8 = vshrl.u32 %v36_v7, 16 }
  0x20   :  { %v38_v9 = vxor.u32 %v37_v8, %v36_v7 }
  0x22   :  { %v39_v10 = vmul.u32 2246822507, %v38_v9 }
  0x24   :  { %v40_v11 = vshrl.u32 %v39_v10, 13 }
  0x26   :  { %v41_v12 = vxor.u32 %v40_v11, %v39_v10 }
  0x28   :  { %v42_v13 = vmul.u32 3266489909, %v41_v12 }
  0x2a   :  { %v43_v15 = vshrl.u32 %v42_v13, 16 }
  0x2c   :  { %v44_v17 = vxor.u32 %v43_v15, %v42_v13 }
  0x2e   :  { %vm45_vm0 = vcmp.ge.u32.totalorder %v44_v17, 2147483648 }
  0x2f   :  { %v48_v18 = vsel %vm45_vm0, %v47_v16, 0.0 }
  0x30   :  { %49 = vst [vmem:[#allocation7] sm:$0xff] %v48_v18 }
  0x31   :  { %100 = shalt.err (!%p97_p12)
}
  0x32   :  { %s101_s27 = scalar_lea.hbm %s161_s2, 128 }
  0x33   :  { %p102_p13 = scmp.ne.s32.totalorder %s161_s2, %s101_s27  ;;  %p105_p0 = scmp.lt.u32.totalorder %s101_s27, %s161_s2 }
  0x35   :  { %p107_p1 = pnand %p105_p0, %p102_p13 }
  0x37   :  { %110 = shalt.err (!%p107_p1)
}
  0x38   :  { %59 = dma.vmem_to_hbm [thread:$0]  %s57_s24, 128, %s161_s2, [#allocation6]  }
  0x39   :  { %113 = dma.done.wait [#allocation6], 128  }
  0x3a   :  { %114 = vsyncadd [#allocation6], 4294967168 }
  0x3b   :  { %63 = vsyncpa [#allocation5], 1 }
  0x3c   :  { %64 = vsyncpa [#allocation6], 1 }

</bundles_post_ra>
